<compile_context>
chip_gen: v7x
topology: tpu7x:2x2x1
jax: 0.10.0
libtpu: 0.0.40
codegen_flags: <defaults>
</compile_context>

<pallas_src>
import jax
import jax.numpy as jnp
from jax import lax
from jax.experimental import pallas as pl
from jax.experimental.pallas import tpu as pltpu


def _block_sum_kernel(x_ref, o_ref):
    """Accumulate the f32 sum of this (tile_m, lane_c) input block into the
    VMEM-resident (8, lane_c) accumulator block (resident across grid axis 1)."""
    tile_m, lane_c = x_ref.shape

    @pl.when(pl.program_id(1) == 0)
    def _init():
        o_ref[...] = jnp.zeros_like(o_ref)

    # Upcast-and-reduce in row chunks so sub-32-bit inputs never materialize a
    # full-block f32 temporary, while the inner loop stays short enough that
    # its overhead is hidden under the block DMA.  tile_m is always a multiple
    # of 8, so the divisor search always succeeds.
    chunk = 8
    for c in range(min(256, tile_m), 7, -8):
        if tile_m % c == 0:
            chunk = c
            break
    n_chunks = tile_m // chunk

    def body(ci, acc):
        r = pl.multiple_of(ci * chunk, chunk)
        xs = x_ref[pl.ds(r, chunk), :].astype(jnp.float32)
        # Fold the chunk into 8-sublane groups -> pure VPU adds, no XLU reduce.
        return acc + jnp.sum(xs.reshape(chunk // 8, 8, lane_c), axis=0)

    acc = lax.fori_loop(
        0, n_chunks, body,
        jnp.zeros((8, lane_c), jnp.float32),
        unroll=(n_chunks <= 8),
    )
    o_ref[...] += acc


def wasserstein_vloss(v, *, target_block_bytes=4 << 20):
    """mean(v) over all elements (Wasserstein_VLOSS.forward)."""
    orig_dtype = v.dtype
    if not jnp.issubdtype(orig_dtype, jnp.floating):
        # torch.mean raises for integer inputs as well.
        raise TypeError(f"mean() expects a floating dtype, got {orig_dtype}")

    n = v.size
    flat = v.reshape(-1)
    itemsize = jnp.dtype(orig_dtype).itemsize
    sub_mult = max(8, 32 // itemsize)      # f32 -> 8, bf16 -> 16, fp8 -> 32

    # Lane-dense width that divides n exactly (no pad / prefix-slice copy).
    lane_c = 0
    for c in (512, 256, 128):
        if n % c == 0 and (n // c) >= sub_mult:
            lane_c = c
            break
    if lane_c == 0:
        # Ragged or tiny input: a plain XLA reduce is already one near-roofline
        # HBM pass and avoids any pad/copy; the Pallas path would only add
        # launch overhead here.
        return jnp.mean(flat.astype(jnp.float32)).astype(orig_dtype)

    rows = n // lane_c
    x2d = flat.reshape(rows, lane_c)       # pure view, no data movement

    # Block rows: ~target_block_bytes per input block, quantized (multiples of
    # 256 rows when possible) so the in-kernel chunk loop stays short.
    quant = 256 if rows >= 256 else sub_mult
    tgt_rows = max(quant,
                   (target_block_bytes // (lane_c * itemsize)) // quant * quant)
    n_est = pl.cdiv(rows, tgt_rows)
    tile_m = max(quant, (rows // n_est) // quant * quant)

    nb = rows // tile_m                    # blocks streamed by the kernel
    krows = nb * tile_m                    # rows covered by the kernel

    # Megacore sharding: smallest non-trivial factor (<= 8) of nb becomes the
    # leading "parallel" axis; the trailing "arbitrary" axis accumulates in
    # the VMEM-resident output block.
    n_par = 1
    for d in (2, 3, 4, 5, 6, 7, 8):
        if nb % d == 0:
            n_par = d
            break
    n_k = nb // n_par

    partials = pl.pallas_call(
        _block_sum_kernel,
        out_shape=jax.ShapeDtypeStruct((n_par * 8, lane_c), jnp.float32),
        grid_spec=pltpu.PrefetchScalarGridSpec(
            num_scalar_prefetch=0,
            grid=(n_par, n_k),
            in_specs=[pl.BlockSpec((tile_m, lane_c),
                                   lambda i, k, n_k=n_k: (i * n_k + k, 0))],
            out_specs=pl.BlockSpec((8, lane_c), lambda i, k: (i, 0)),
        ),
        compiler_params=pltpu.CompilerParams(
            dimension_semantics=("parallel", "arbitrary"),
            vmem_limit_bytes=32 * 1024 * 1024,
        ),
    )(x2d)

    total = jnp.sum(partials, dtype=jnp.float32)
    if krows < rows:
        # Leftover full rows (< tile_m of them): tiny fused XLA reduce over a
        # slice of the same buffer — no copy, no pad.
        total = total + jnp.sum(x2d[krows:, :], dtype=jnp.float32)

    mean = total / jnp.float32(n)
    return mean.astype(orig_dtype)


if __name__ == "__main__":
    key = jax.random.PRNGKey(0)
    k1, k2, k3, k4 = jax.random.split(key, 4)

    # 1) Typical NCHW activation tensor: single-block kernel path.
    x = jax.random.normal(k1, (2, 4, 16, 16), dtype=jnp.float32)
    out = jax.block_until_ready(wasserstein_vloss(x))
    ref = jnp.mean(x)
    assert jnp.allclose(out, ref, rtol=1e-5, atol=1e-6), (out, ref)

    # 2) Ragged element count: plain-XLA fallback path (no pad copy).
    y = jax.random.normal(k2, (3, 5, 7, 11), dtype=jnp.float32)
    out_y = jax.block_until_ready(wasserstein_vloss(y))
    ref_y = jnp.mean(y)
    assert jnp.allclose(out_y, ref_y, rtol=1e-5, atol=1e-6), (out_y, ref_y)

    # 3) bf16 input: chunked in-kernel upcast path, f32 accumulation.
    z = jax.random.normal(k3, (4, 16, 32), dtype=jnp.float32).astype(jnp.bfloat16)
    out_z = jax.block_until_ready(wasserstein_vloss(z))
    ref_z = jnp.mean(z.astype(jnp.float32)).astype(jnp.bfloat16)
    assert jnp.allclose(out_z.astype(jnp.float32), ref_z.astype(jnp.float32),
                        rtol=2e-2, atol=2e-2), (out_z, ref_z)

    # 4) Larger tensor: defaults exercise the multi-chunk inner loop; the small
    #    block override exercises multi-block accumulation over the trailing
    #    "arbitrary" axis plus the leading "parallel" (megacore) axis.
    w = jax.random.normal(k4, (8, 16, 64, 64), dtype=jnp.float32)
    ref_w = jnp.mean(w)
    out_w = jax.block_until_ready(wasserstein_vloss(w))
    assert jnp.allclose(out_w, ref_w, rtol=1e-5, atol=1e-6), (out_w, ref_w)
    out_w2 = jax.block_until_ready(
        wasserstein_vloss(w, target_block_bytes=16 * 1024))
    assert jnp.allclose(out_w2, ref_w, rtol=1e-5, atol=1e-6), (out_w2, ref_w)

    print("KERNEL_OK")
</pallas_src>

<mosaic_0001>
module attributes {stable_mosaic.version = 11 : i64} {
  func.func @_block_sum_kernel(%arg0: i32, %arg1: i32, %arg2: memref<8x256xf32, #tpu.memory_space<vmem>>, %arg3: memref<8x256xf32, #tpu.memory_space<vmem>>) attributes {dimension_semantics = [#tpu.dimension_semantics<parallel>, #tpu.dimension_semantics<arbitrary>], iteration_bounds = array<i64: 1, 1>, scalar_prefetch = 0 : i64, scratch_operands = 0 : i64, tpu.core_type = #tpu.core_type<tc>, window_params = [{transform_indices = @transform_0, window_bounds = array<i64: 8, 256>}, {transform_indices = @transform_1, window_bounds = array<i64: 8, 256>}]} {
    %c0_i32 = arith.constant 0 : i32
    %0 = arith.cmpi eq, %arg1, %c0_i32 : i32
    %1 = arith.extui %0 : i1 to i32
    %c0_i32_0 = arith.constant 0 : i32
    %2 = arith.cmpi ne, %1, %c0_i32_0 : i32
    scf.if %2 {
      %cst_7 = arith.constant 0.000000e+00 : f32
      %14 = vector.broadcast %cst_7 : f32 to vector<8x256xf32>
      %c0_8 = arith.constant 0 : index
      %c0_9 = arith.constant 0 : index
      %15 = vector.load %arg3[%c0_8, %c0_9] : memref<8x256xf32, #tpu.memory_space<vmem>>, vector<8x256xf32>
      tpu.vector_store %arg3[%c0_8, %c0_9], %14 {strides = array<i32>} : memref<8x256xf32, #tpu.memory_space<vmem>>, vector<8x256xf32>,
    } else {
    }
    %cst = arith.constant 0.000000e+00 : f32
    %3 = vector.broadcast %cst : f32 to vector<8x256xf32>
    %c0_i32_1 = arith.constant 0 : i32
    %c8_i32 = arith.constant 8 : i32
    %4 = arith.muli %c0_i32_1, %c8_i32 : i32
    %5 = tpu.assume_multiple %4, 8 : i32
    %6 = arith.index_cast %5 : i32 to index
    %c0 = arith.constant 0 : index
    %7 = vector.load %arg2[%6, %c0] : memref<8x256xf32, #tpu.memory_space<vmem>>, vector<8x256xf32>
    %8 = vector.shape_cast %7 : vector<8x256xf32> to vector<1x8x256xf32>
    %cst_2 = arith.constant dense<0.000000e+00> : vector<8x256xf32>
    %9 = vector.multi_reduction <add>, %8, %cst_2 [0] : vector<1x8x256xf32> to vector<8x256xf32>
    %10 = arith.addf %3, %9 : vector<8x256xf32>
    %c1_i32 = arith.constant 1 : i32
    %c0_3 = arith.constant 0 : index
    %c0_4 = arith.constant 0 : index
    %11 = vector.load %arg3[%c0_3, %c0_4] : memref<8x256xf32, #tpu.memory_space<vmem>>, vector<8x256xf32>
    %12 = arith.addf %11, %10 : vector<8x256xf32>
    %c0_5 = arith.constant 0 : index
    %c0_6 = arith.constant 0 : index
    %13 = vector.load %arg3[%c0_5, %c0_6] : memref<8x256xf32, #tpu.memory_space<vmem>>, vector<8x256xf32>
    tpu.vector_store %arg3[%c0_5, %c0_6], %12 {strides = array<i32>} : memref<8x256xf32, #tpu.memory_space<vmem>>, vector<8x256xf32>,
    return
  }
  func.func @transform_0(%arg0: i32, %arg1: i32) -> (i32, i32) {
    %c1_i32 = arith.constant 1 : i32
    %0 = arith.muli %arg0, %c1_i32 : i32
    %1 = arith.addi %0, %arg1 : i32
    %c0_i32 = arith.constant 0 : i32
    %c0_i32_0 = arith.constant 0 : i32
    return %1, %c0_i32 : i32, i32
  }
  func.func @transform_1(%arg0: i32, %arg1: i32) -> (i32, i32) {
    %c0_i32 = arith.constant 0 : i32
    %c0_i32_0 = arith.constant 0 : i32
    return %arg0, %c0_i32 : i32, i32
  }
}

</mosaic_0001>

<bundles_post_ra>
// kernel: tpu_custom_call.1
= control target key start
LH: loop header
LB: loop body
LE: loop exit
PB: predicated region body
PF: predicated region fallthrough
CT: control target
= control target key end

     0   :  { %6 = vsyncpa [#allocation3], 0  ;;  %s149_s0 = inlined_call_operand.hbm [shape: f32[8,256], index: 0, kind: input, shape index: {}]   ;;  %s150_s1 = inlined_call_operand.hbm [shape: f32[8,256], index: 1, kind: output, shape index: {}]  }
   0x1   :  { %7 = vsyncpa [#allocation4], 0  ;;  %s113_s6 = smov [#allocation2]   ;;  %s65_s10 = scalar_lea.hbm %s149_s0, 256 }
   0x2   :  { %s18_s7 = sshll.u32 %s113_s6, 4  ;;  %p66_p0 = scmp.ne.s32.totalorder %s149_s0, %s65_s10  ;;  %s19_s7 = int_to_ptr.vmem [resolvable:$true] %s18_s7 }
   0x3   :  { %p69_p1 = scmp.lt.u32.totalorder %s65_s10, %s149_s0 }
   0x5   :  { %p71_p2 = pnand %p69_p1, %p66_p0 }
   0x7   :  { %74 = shalt.err (!%p71_p2)
}
   0x8   :  { %s75_s15 = scalar_lea.vmem %s19_s7, 256  ;;  %p80_p4 = scmp.lt.s32.totalorder %s19_s7, %s19_s7 }
   0x9   :  { %p76_p3 = scmp.ne.s32.totalorder %s19_s7, %s75_s15  ;;  %p81_p5 = scmp.lt.s32.totalorder %s75_s15, %s75_s15 }
   0xb   :  { %p82_p6 = por %p81_p5, %p80_p4 }
   0xd   :  { %p83_p7 = pnand %p82_p6, %p76_p3 }
   0xf   :  { %86 = shalt.err (!%p83_p7)
}
  0x10   :  { %21 = dma.hbm_to_vmem [thread:$0]  %s149_s0, 256, %s19_s7, [#allocation3]  }
  0x11   :  { %109 = dma.done.wait [#allocation3], 256  }
  0x12   :  { %110 = vsyncadd [#allocation3], 4294967040  ;;  %s114_s18 = smov [#allocation5]   ;;  %v35_v0 = vld [vmem:[#allocation2] sm:$0xff]  ;;  %v36_v1 = vld [vmem:[#allocation2 + $0x8] sm:$0xff] }
  0x13   :  { %s53_s19 = sshll.u32 %s114_s18, 4  ;;  %45 = vst [vmem:[#allocation5] sm:$0xff] %v35_v0  ;;  %46 = vst [vmem:[#allocation5 + $0x8] sm:$0xff] %v36_v1  ;;  %s54_s19 = int_to_ptr.vmem [resolvable:$true] %s53_s19 }
  0x14   :  { %s87_s20 = scalar_lea.vmem %s54_s19, 256  ;;  %p92_p9 = scmp.lt.s32.totalorder %s54_s19, %s54_s19 }
  0x15   :  { %p88_p8 = scmp.ne.s32.totalorder %s54_s19, %s87_s20  ;;  %p93_p10 = scmp.lt.s32.totalorder %s87_s20, %s87_s20 }
  0x17   :  { %p94_p11 = por %p93_p10, %p92_p9 }
  0x19   :  { %p95_p12 = pnand %p94_p11, %p88_p8 }
  0x1b   :  { %98 = shalt.err (!%p95_p12)
}
  0x1c   :  { %s99_s0 = scalar_lea.hbm %s150_s1, 256 }
  0x1d   :  { %p100_p13 = scmp.ne.s32.totalorder %s150_s1, %s99_s0  ;;  %p103_p0 = scmp.lt.u32.totalorder %s99_s0, %s150_s1 }
  0x1f   :  { %p105_p1 = pnand %p103_p0, %p100_p13 }
  0x21   :  { %108 = shalt.err (!%p105_p1)
}
  0x22   :  { %56 = dma.vmem_to_hbm [thread:$0]  %s54_s19, 256, %s150_s1, [#allocation4]  }
  0x23   :  { %111 = dma.done.wait [#allocation4], 256  }
  0x24   :  { %112 = vsyncadd [#allocation4], 4294967040 }
  0x25   :  { %60 = vsyncpa [#allocation3], 1 }
  0x26   :  { %61 = vsyncpa [#allocation4], 1 }

</bundles_post_ra>
